<compile_context>
chip_gen: v7x
topology: tpu7x:2x2x1
jax: 0.10.0
libtpu: 0.0.40
codegen_flags: <defaults>
</compile_context>

<pallas_src>
import math

import numpy as np

import jax
import jax.numpy as jnp
from jax.experimental import pallas as pl
from jax.experimental.pallas import tpu as pltpu


# --------------------------------------------------------------------------
# Glue: 1-D align_corners=True linear interpolation matrix (out_size, in_size)
# --------------------------------------------------------------------------
def _interp_matrix_1d(in_size: int, out_size: int) -> np.ndarray:
    w = np.zeros((out_size, in_size), dtype=np.float32)
    if out_size == 1:
        src = np.zeros((1,), dtype=np.float64)
    else:
        src = np.arange(out_size, dtype=np.float64) * (
            (in_size - 1) / (out_size - 1)
        )
    lo = np.clip(np.floor(src).astype(np.int64), 0, in_size - 1)
    hi = np.minimum(lo + 1, in_size - 1)
    frac = (src - lo).astype(np.float32)
    rows = np.arange(out_size)
    np.add.at(w, (rows, lo), 1.0 - frac)
    np.add.at(w, (rows, hi), frac)
    return w


def _round_up(x: int, m: int) -> int:
    return ((x + m - 1) // m) * m


def _largest_divisor(n: int, cap: int) -> int:
    for t in range(min(cap, n), 0, -1):
        if n % t == 0:
            return t
    return 1


def _pick_lane_tile(n: int) -> int:
    """Lane-dim tile: full extent when small, else the largest multiple-of-128
    divisor of n that is <= 4096 (keeps blocks both legal and VMEM-friendly)."""
    if n <= 4096 or n % 128 != 0:
        return n
    best = 128
    t = 128
    while t <= 4096:
        if n % t == 0:
            best = t
        t += 128
    return best


# --------------------------------------------------------------------------
# Kernel 1: right matmul with a tall M axis.   (tm, K) @ (K, Nout)
# K / Nout are tiny 1-D spatial extents -> no K grid, no accumulator.
# --------------------------------------------------------------------------
def _mm_right_kernel(x_ref, w_ref, o_ref):
    o_ref[...] = jnp.dot(
        x_ref[...], w_ref[...], preferred_element_type=jnp.float32
    ).astype(o_ref.dtype)


def _mm_right(x2d: jnp.ndarray, w: jnp.ndarray) -> jnp.ndarray:
    """y = x2d @ w, tiled over the (tall) M axis."""
    m_dim, k = x2d.shape
    k2, n_out = w.shape
    assert k == k2

    tm = min(1024, _round_up(m_dim, 8))
    m_pad = pl.cdiv(m_dim, tm) * tm
    if m_pad != m_dim:
        x2d = jnp.pad(x2d, ((0, m_pad - m_dim), (0, 0)))
    grid = (m_pad // tm,)

    vmem_bytes = 4 * (2 * tm * k + k * n_out + 2 * tm * n_out) + (4 << 20)

    y = pl.pallas_call(
        _mm_right_kernel,
        out_shape=jax.ShapeDtypeStruct((m_pad, n_out), jnp.float32),
        grid_spec=pltpu.PrefetchScalarGridSpec(
            num_scalar_prefetch=0,
            grid=grid,
            in_specs=[
                pl.BlockSpec((tm, k), lambda i: (i, 0)),      # activations tile
                pl.BlockSpec((k, n_out), lambda i: (0, 0)),   # tiny 1-D weights
            ],
            out_specs=pl.BlockSpec((tm, n_out), lambda i: (i, 0)),
        ),
        compiler_params=pltpu.CompilerParams(
            dimension_semantics=("parallel",),
            vmem_limit_bytes=min(vmem_bytes, 48 << 20),
        ),
    )(x2d, w)

    if m_pad != m_dim:
        y = y[:m_dim]
    return y


# --------------------------------------------------------------------------
# Kernel 2/3: batched LEFT matmul  out[b] = W @ x[b]
#   W (Mo, K) small and resident; x (B, K, N) with lane-dense N.
#   Grid over (batch tiles, lane tiles); contraction dim K stays full-extent.
# --------------------------------------------------------------------------
def _mm_left_kernel(w_ref, x_ref, o_ref):
    w = w_ref[...]
    for b in range(x_ref.shape[0]):   # static unroll over the small batch tile
        o_ref[b] = jnp.dot(
            w, x_ref[b], preferred_element_type=jnp.float32
        ).astype(o_ref.dtype)


def _mm_left(w: jnp.ndarray, x3d: jnp.ndarray) -> jnp.ndarray:
    """out[b] = w @ x3d[b]   with w (Mo, K), x3d (B, K, N) -> (B, Mo, N)."""
    b_dim, k, n = x3d.shape
    mo, k2 = w.shape
    assert k == k2

    tb = _largest_divisor(b_dim, 8)
    tn = _pick_lane_tile(n)
    grid = (b_dim // tb, n // tn)

    vmem_bytes = 4 * (2 * tb * k * tn + mo * k + 2 * tb * mo * tn) + (4 << 20)

    return pl.pallas_call(
        _mm_left_kernel,
        out_shape=jax.ShapeDtypeStruct((b_dim, mo, n), jnp.float32),
        grid_spec=pltpu.PrefetchScalarGridSpec(
            num_scalar_prefetch=0,
            grid=grid,
            in_specs=[
                pl.BlockSpec((mo, k), lambda i, j: (0, 0)),        # resident weights
                pl.BlockSpec((tb, k, tn), lambda i, j: (i, 0, j)),  # batch/lane tile
            ],
            out_specs=pl.BlockSpec((tb, mo, tn), lambda i, j: (i, 0, j)),
        ),
        compiler_params=pltpu.CompilerParams(
            dimension_semantics=("parallel", "parallel"),
            vmem_limit_bytes=min(vmem_bytes, 48 << 20),
        ),
    )(w, x3d)


# --------------------------------------------------------------------------
# Wrapper: Resize(vel_resize).forward(x), x is NCDHW.
# --------------------------------------------------------------------------
def resize_pallas(x: jnp.ndarray, vel_resize: float) -> jnp.ndarray:
    factor = 1.0 / vel_resize
    if factor == 1.0:
        return x

    n, c, d, h, w = x.shape
    do = int(math.floor(d * factor))
    ho = int(math.floor(h * factor))
    wo = int(math.floor(w * factor))

    # 1-D interpolation matrices; `factor` folded into Wd (the whole map is
    # linear, so both PyTorch branches reduce to factor * interpolate(x)).
    ww_t = jnp.asarray(_interp_matrix_1d(w, wo).T)                       # (W, Wo)
    wd = jnp.asarray(_interp_matrix_1d(d, do) * np.float32(factor))      # (Do, D)
    wh = jnp.asarray(_interp_matrix_1d(h, ho))                           # (Ho, H)

    xf = x.astype(jnp.float32)

    # 1) contract W (right matmul, tall M): (N*C*D*H, W) @ (W, Wo)
    t = _mm_right(xf.reshape(n * c * d * h, w), ww_t)      # (N*C*D*H, Wo)

    # 2) contract D (left batched matmul, lane-dense N = H*Wo)
    t = t.reshape(n * c, d, h * wo)                        # contiguous view
    t = _mm_left(wd, t)                                    # (N*C, Do, H*Wo)

    # 3) contract H (left batched matmul over N*C*Do)
    t = t.reshape(n * c * do, h, wo)                       # contiguous view
    t = _mm_left(wh, t)                                    # (N*C*Do, Ho, Wo)

    # Already in the target (N, C, Do, Ho, Wo) memory order: no transpose.
    y = t.reshape(n, c, do, ho, wo)
    return y.astype(x.dtype)


# --------------------------------------------------------------------------
# Pure-JAX reference of the same trilinear map (for validation).
# --------------------------------------------------------------------------
def _resize_ref(x: jnp.ndarray, vel_resize: float) -> jnp.ndarray:
    factor = 1.0 / vel_resize
    if factor == 1.0:
        return x
    n, c, d, h, w = x.shape
    do = int(math.floor(d * factor))
    ho = int(math.floor(h * factor))
    wo = int(math.floor(w * factor))
    wd = jnp.asarray(_interp_matrix_1d(d, do))   # (Do, D)
    wh = jnp.asarray(_interp_matrix_1d(h, ho))   # (Ho, H)
    ww = jnp.asarray(_interp_matrix_1d(w, wo))   # (Wo, W)
    y = jnp.einsum(
        "ncdhw,ad,eh,fw->ncaef", x.astype(jnp.float32), wd, wh, ww
    )
    return (jnp.float32(factor) * y).astype(x.dtype)


if __name__ == "__main__":
    key = jax.random.PRNGKey(0)
    # Small 5-D NCDHW input consistent with trilinear interpolation.
    x = jax.random.normal(key, (2, 4, 8, 8, 8), dtype=jnp.float32)

    resize_jit = jax.jit(resize_pallas, static_argnames="vel_resize")

    # Downsample branch: factor = 0.5  (interpolate then scale)
    y_dn = jax.block_until_ready(resize_jit(x, vel_resize=2.0))
    ref_dn = _resize_ref(x, vel_resize=2.0)
    assert y_dn.shape == (2, 4, 4, 4, 4), y_dn.shape
    assert jnp.allclose(y_dn, ref_dn, atol=1e-4, rtol=1e-4), float(
        jnp.max(jnp.abs(y_dn - ref_dn))
    )

    # Upsample branch: factor = 2.0  (scale then interpolate == same linear map)
    y_up = jax.block_until_ready(resize_jit(x, vel_resize=0.5))
    ref_up = _resize_ref(x, vel_resize=0.5)
    assert y_up.shape == (2, 4, 16, 16, 16), y_up.shape
    assert jnp.allclose(y_up, ref_up, atol=1e-4, rtol=1e-4), float(
        jnp.max(jnp.abs(y_up - ref_up))
    )

    print("KERNEL_OK")
</pallas_src>

<mosaic_0001>
module attributes {stable_mosaic.version = 11 : i64} {
  func.func @_mm_left_kernel(%arg0: i32, %arg1: i32, %arg2: memref<4x8xf32, #tpu.memory_space<vmem>>, %arg3: memref<8x8x32xf32, #tpu.memory_space<vmem>>, %arg4: memref<8x4x32xf32, #tpu.memory_space<vmem>>) attributes {dimension_semantics = [#tpu.dimension_semantics<parallel>, #tpu.dimension_semantics<parallel>], iteration_bounds = array<i64: 1, 1>, scalar_prefetch = 0 : i64, scratch_operands = 0 : i64, tpu.core_type = #tpu.core_type<tc>, window_params = [{pipeline_mode = #tpu.pipeline_mode<synchronous>, transform_indices = @transform_0, window_bounds = array<i64: 4, 8>}, {transform_indices = @transform_1, window_bounds = array<i64: 8, 8, 32>}, {transform_indices = @transform_2, window_bounds = array<i64: 8, 4, 32>}]} {
    %c0 = arith.constant 0 : index
    %c0_0 = arith.constant 0 : index
    %0 = vector.load %arg2[%c0, %c0_0] : memref<4x8xf32, #tpu.memory_space<vmem>>, vector<4x8xf32>
    %c0_1 = arith.constant 0 : index
    %c0_2 = arith.constant 0 : index
    %c0_3 = arith.constant 0 : index
    %1 = vector.load %arg3[%c0_1, %c0_2, %c0_3] : memref<8x8x32xf32, #tpu.memory_space<vmem>>, vector<1x8x32xf32>
    %2 = vector.shape_cast %1 : vector<1x8x32xf32> to vector<8x32xf32>
    %cst = arith.constant dense<0.000000e+00> : vector<4x32xf32>
    %3 = tpu.matmul %0, %2, %cst {dimension_numbers = #tpu.dot_dimension_numbers<[1], [0], [0], [1], [0, 0, 1, 1], [], []>} : vector<4x8xf32>, vector<8x32xf32>, vector<4x32xf32> -> vector<4x32xf32>
    %c0_4 = arith.constant 0 : index
    %c0_5 = arith.constant 0 : index
    %c0_6 = arith.constant 0 : index
    %4 = vector.load %arg4[%c0_4, %c0_5, %c0_6] : memref<8x4x32xf32, #tpu.memory_space<vmem>>, vector<1x4x32xf32>
    %5 = vector.shape_cast %4 : vector<1x4x32xf32> to vector<4x32xf32>
    %6 = vector.shape_cast %3 : vector<4x32xf32> to vector<1x4x32xf32>
    tpu.vector_store %arg4[%c0_4, %c0_5, %c0_6], %6 {strides = array<i32>} : memref<8x4x32xf32, #tpu.memory_space<vmem>>, vector<1x4x32xf32>,
    %c1 = arith.constant 1 : index
    %c0_7 = arith.constant 0 : index
    %c0_8 = arith.constant 0 : index
    %7 = vector.load %arg3[%c1, %c0_7, %c0_8] : memref<8x8x32xf32, #tpu.memory_space<vmem>>, vector<1x8x32xf32>
    %8 = vector.shape_cast %7 : vector<1x8x32xf32> to vector<8x32xf32>
    %cst_9 = arith.constant dense<0.000000e+00> : vector<4x32xf32>
    %9 = tpu.matmul %0, %8, %cst_9 {dimension_numbers = #tpu.dot_dimension_numbers<[1], [0], [0], [1], [0, 0, 1, 1], [], []>} : vector<4x8xf32>, vector<8x32xf32>, vector<4x32xf32> -> vector<4x32xf32>
    %c1_10 = arith.constant 1 : index
    %c0_11 = arith.constant 0 : index
    %c0_12 = arith.constant 0 : index
    %10 = vector.load %arg4[%c1_10, %c0_11, %c0_12] : memref<8x4x32xf32, #tpu.memory_space<vmem>>, vector<1x4x32xf32>
    %11 = vector.shape_cast %10 : vector<1x4x32xf32> to vector<4x32xf32>
    %12 = vector.shape_cast %9 : vector<4x32xf32> to vector<1x4x32xf32>
    tpu.vector_store %arg4[%c1_10, %c0_11, %c0_12], %12 {strides = array<i32>} : memref<8x4x32xf32, #tpu.memory_space<vmem>>, vector<1x4x32xf32>,
    %c2 = arith.constant 2 : index
    %c0_13 = arith.constant 0 : index
    %c0_14 = arith.constant 0 : index
    %13 = vector.load %arg3[%c2, %c0_13, %c0_14] : memref<8x8x32xf32, #tpu.memory_space<vmem>>, vector<1x8x32xf32>
    %14 = vector.shape_cast %13 : vector<1x8x32xf32> to vector<8x32xf32>
    %cst_15 = arith.constant dense<0.000000e+00> : vector<4x32xf32>
    %15 = tpu.matmul %0, %14, %cst_15 {dimension_numbers = #tpu.dot_dimension_numbers<[1], [0], [0], [1], [0, 0, 1, 1], [], []>} : vector<4x8xf32>, vector<8x32xf32>, vector<4x32xf32> -> vector<4x32xf32>
    %c2_16 = arith.constant 2 : index
    %c0_17 = arith.constant 0 : index
    %c0_18 = arith.constant 0 : index
    %16 = vector.load %arg4[%c2_16, %c0_17, %c0_18] : memref<8x4x32xf32, #tpu.memory_space<vmem>>, vector<1x4x32xf32>
    %17 = vector.shape_cast %16 : vector<1x4x32xf32> to vector<4x32xf32>
    %18 = vector.shape_cast %15 : vector<4x32xf32> to vector<1x4x32xf32>
    tpu.vector_store %arg4[%c2_16, %c0_17, %c0_18], %18 {strides = array<i32>} : memref<8x4x32xf32, #tpu.memory_space<vmem>>, vector<1x4x32xf32>,
    %c3 = arith.constant 3 : index
    %c0_19 = arith.constant 0 : index
    %c0_20 = arith.constant 0 : index
    %19 = vector.load %arg3[%c3, %c0_19, %c0_20] : memref<8x8x32xf32, #tpu.memory_space<vmem>>, vector<1x8x32xf32>
    %20 = vector.shape_cast %19 : vector<1x8x32xf32> to vector<8x32xf32>
    %cst_21 = arith.constant dense<0.000000e+00> : vector<4x32xf32>
    %21 = tpu.matmul %0, %20, %cst_21 {dimension_numbers = #tpu.dot_dimension_numbers<[1], [0], [0], [1], [0, 0, 1, 1], [], []>} : vector<4x8xf32>, vector<8x32xf32>, vector<4x32xf32> -> vector<4x32xf32>
    %c3_22 = arith.constant 3 : index
    %c0_23 = arith.constant 0 : index
    %c0_24 = arith.constant 0 : index
    %22 = vector.load %arg4[%c3_22, %c0_23, %c0_24] : memref<8x4x32xf32, #tpu.memory_space<vmem>>, vector<1x4x32xf32>
    %23 = vector.shape_cast %22 : vector<1x4x32xf32> to vector<4x32xf32>
    %24 = vector.shape_cast %21 : vector<4x32xf32> to vector<1x4x32xf32>
    tpu.vector_store %arg4[%c3_22, %c0_23, %c0_24], %24 {strides = array<i32>} : memref<8x4x32xf32, #tpu.memory_space<vmem>>, vector<1x4x32xf32>,
    %c4 = arith.constant 4 : index
    %c0_25 = arith.constant 0 : index
    %c0_26 = arith.constant 0 : index
    %25 = vector.load %arg3[%c4, %c0_25, %c0_26] : memref<8x8x32xf32, #tpu.memory_space<vmem>>, vector<1x8x32xf32>
    %26 = vector.shape_cast %25 : vector<1x8x32xf32> to vector<8x32xf32>
    %cst_27 = arith.constant dense<0.000000e+00> : vector<4x32xf32>
    %27 = tpu.matmul %0, %26, %cst_27 {dimension_numbers = #tpu.dot_dimension_numbers<[1], [0], [0], [1], [0, 0, 1, 1], [], []>} : vector<4x8xf32>, vector<8x32xf32>, vector<4x32xf32> -> vector<4x32xf32>
    %c4_28 = arith.constant 4 : index
    %c0_29 = arith.constant 0 : index
    %c0_30 = arith.constant 0 : index
    %28 = vector.load %arg4[%c4_28, %c0_29, %c0_30] : memref<8x4x32xf32, #tpu.memory_space<vmem>>, vector<1x4x32xf32>
    %29 = vector.shape_cast %28 : vector<1x4x32xf32> to vector<4x32xf32>
    %30 = vector.shape_cast %27 : vector<4x32xf32> to vector<1x4x32xf32>
    tpu.vector_store %arg4[%c4_28, %c0_29, %c0_30], %30 {strides = array<i32>} : memref<8x4x32xf32, #tpu.memory_space<vmem>>, vector<1x4x32xf32>,
    %c5 = arith.constant 5 : index
    %c0_31 = arith.constant 0 : index
    %c0_32 = arith.constant 0 : index
    %31 = vector.load %arg3[%c5, %c0_31, %c0_32] : memref<8x8x32xf32, #tpu.memory_space<vmem>>, vector<1x8x32xf32>
    %32 = vector.shape_cast %31 : vector<1x8x32xf32> to vector<8x32xf32>
    %cst_33 = arith.constant dense<0.000000e+00> : vector<4x32xf32>
    %33 = tpu.matmul %0, %32, %cst_33 {dimension_numbers = #tpu.dot_dimension_numbers<[1], [0], [0], [1], [0, 0, 1, 1], [], []>} : vector<4x8xf32>, vector<8x32xf32>, vector<4x32xf32> -> vector<4x32xf32>
    %c5_34 = arith.constant 5 : index
    %c0_35 = arith.constant 0 : index
    %c0_36 = arith.constant 0 : index
    %34 = vector.load %arg4[%c5_34, %c0_35, %c0_36] : memref<8x4x32xf32, #tpu.memory_space<vmem>>, vector<1x4x32xf32>
    %35 = vector.shape_cast %34 : vector<1x4x32xf32> to vector<4x32xf32>
    %36 = vector.shape_cast %33 : vector<4x32xf32> to vector<1x4x32xf32>
    tpu.vector_store %arg4[%c5_34, %c0_35, %c0_36], %36 {strides = array<i32>} : memref<8x4x32xf32, #tpu.memory_space<vmem>>, vector<1x4x32xf32>,
    %c6 = arith.constant 6 : index
    %c0_37 = arith.constant 0 : index
    %c0_38 = arith.constant 0 : index
    %37 = vector.load %arg3[%c6, %c0_37, %c0_38] : memref<8x8x32xf32, #tpu.memory_space<vmem>>, vector<1x8x32xf32>
    %38 = vector.shape_cast %37 : vector<1x8x32xf32> to vector<8x32xf32>
    %cst_39 = arith.constant dense<0.000000e+00> : vector<4x32xf32>
    %39 = tpu.matmul %0, %38, %cst_39 {dimension_numbers = #tpu.dot_dimension_numbers<[1], [0], [0], [1], [0, 0, 1, 1], [], []>} : vector<4x8xf32>, vector<8x32xf32>, vector<4x32xf32> -> vector<4x32xf32>
    %c6_40 = arith.constant 6 : index
    %c0_41 = arith.constant 0 : index
    %c0_42 = arith.constant 0 : index
    %40 = vector.load %arg4[%c6_40, %c0_41, %c0_42] : memref<8x4x32xf32, #tpu.memory_space<vmem>>, vector<1x4x32xf32>
    %41 = vector.shape_cast %40 : vector<1x4x32xf32> to vector<4x32xf32>
    %42 = vector.shape_cast %39 : vector<4x32xf32> to vector<1x4x32xf32>
    tpu.vector_store %arg4[%c6_40, %c0_41, %c0_42], %42 {strides = array<i32>} : memref<8x4x32xf32, #tpu.memory_space<vmem>>, vector<1x4x32xf32>,
    %c7 = arith.constant 7 : index
    %c0_43 = arith.constant 0 : index
    %c0_44 = arith.constant 0 : index
    %43 = vector.load %arg3[%c7, %c0_43, %c0_44] : memref<8x8x32xf32, #tpu.memory_space<vmem>>, vector<1x8x32xf32>
    %44 = vector.shape_cast %43 : vector<1x8x32xf32> to vector<8x32xf32>
    %cst_45 = arith.constant dense<0.000000e+00> : vector<4x32xf32>
    %45 = tpu.matmul %0, %44, %cst_45 {dimension_numbers = #tpu.dot_dimension_numbers<[1], [0], [0], [1], [0, 0, 1, 1], [], []>} : vector<4x8xf32>, vector<8x32xf32>, vector<4x32xf32> -> vector<4x32xf32>
    %c7_46 = arith.constant 7 : index
    %c0_47 = arith.constant 0 : index
    %c0_48 = arith.constant 0 : index
    %46 = vector.load %arg4[%c7_46, %c0_47, %c0_48] : memref<8x4x32xf32, #tpu.memory_space<vmem>>, vector<1x4x32xf32>
    %47 = vector.shape_cast %46 : vector<1x4x32xf32> to vector<4x32xf32>
    %48 = vector.shape_cast %45 : vector<4x32xf32> to vector<1x4x32xf32>
    tpu.vector_store %arg4[%c7_46, %c0_47, %c0_48], %48 {strides = array<i32>} : memref<8x4x32xf32, #tpu.memory_space<vmem>>, vector<1x4x32xf32>,
    return
  }
  func.func @transform_0(%arg0: i32, %arg1: i32) -> (i32, i32) {
    %c0_i32 = arith.constant 0 : i32
    %c0_i32_0 = arith.constant 0 : i32
    %c0_i32_1 = arith.constant 0 : i32
    return %c0_i32, %c0_i32_0 : i32, i32
  }
  func.func @transform_1(%arg0: i32, %arg1: i32) -> (i32, i32, i32) {
    %c0_i32 = arith.constant 0 : i32
    %c0_i32_0 = arith.constant 0 : i32
    return %arg0, %c0_i32, %arg1 : i32, i32, i32
  }
  func.func @transform_2(%arg0: i32, %arg1: i32) -> (i32, i32, i32) {
    %c0_i32 = arith.constant 0 : i32
    %c0_i32_0 = arith.constant 0 : i32
    return %arg0, %c0_i32, %arg1 : i32, i32, i32
  }
}

module attributes {stable_mosaic.version = 11 : i64} {
  func.func @_mm_right_kernel(%arg0: i32, %arg1: memref<512x8xf32, #tpu.memory_space<vmem>>, %arg2: memref<8x4xf32, #tpu.memory_space<vmem>>, %arg3: memref<512x4xf32, #tpu.memory_space<vmem>>) attributes {dimension_semantics = [#tpu.dimension_semantics<parallel>], iteration_bounds = array<i64: 1>, scalar_prefetch = 0 : i64, scratch_operands = 0 : i64, tpu.core_type = #tpu.core_type<tc>, window_params = [{transform_indices = @transform_0, window_bounds = array<i64: 512, 8>}, {pipeline_mode = #tpu.pipeline_mode<synchronous>, transform_indices = @transform_1, window_bounds = array<i64: 8, 4>}, {transform_indices = @transform_2, window_bounds = array<i64: 512, 4>}]} {
    %c0 = arith.constant 0 : index
    %c0_0 = arith.constant 0 : index
    %0 = vector.load %arg1[%c0, %c0_0] : memref<512x8xf32, #tpu.memory_space<vmem>>, vector<512x8xf32>
    %c0_1 = arith.constant 0 : index
    %c0_2 = arith.constant 0 : index
    %1 = vector.load %arg2[%c0_1, %c0_2] : memref<8x4xf32, #tpu.memory_space<vmem>>, vector<8x4xf32>
    %cst = arith.constant dense<0.000000e+00> : vector<512x4xf32>
    %2 = tpu.matmul %0, %1, %cst {dimension_numbers = #tpu.dot_dimension_numbers<[1], [0], [0], [1], [0, 0, 1, 1], [], []>} : vector<512x8xf32>, vector<8x4xf32>, vector<512x4xf32> -> vector<512x4xf32>
    %c0_3 = arith.constant 0 : index
    %c0_4 = arith.constant 0 : index
    %3 = vector.load %arg3[%c0_3, %c0_4] : memref<512x4xf32, #tpu.memory_space<vmem>>, vector<512x4xf32>
    tpu.vector_store %arg3[%c0_3, %c0_4], %2 {strides = array<i32>} : memref<512x4xf32, #tpu.memory_space<vmem>>, vector<512x4xf32>,
    return
  }
  func.func @transform_0(%arg0: i32) -> (i32, i32) {
    %c0_i32 = arith.constant 0 : i32
    %c0_i32_0 = arith.constant 0 : i32
    return %arg0, %c0_i32 : i32, i32
  }
  func.func @transform_1(%arg0: i32) -> (i32, i32) {
    %c0_i32 = arith.constant 0 : i32
    %c0_i32_0 = arith.constant 0 : i32
    %c0_i32_1 = arith.constant 0 : i32
    return %c0_i32, %c0_i32_0 : i32, i32
  }
  func.func @transform_2(%arg0: i32) -> (i32, i32) {
    %c0_i32 = arith.constant 0 : i32
    %c0_i32_0 = arith.constant 0 : i32
    return %arg0, %c0_i32 : i32, i32
  }
}

module attributes {stable_mosaic.version = 11 : i64} {
  func.func @_mm_left_kernel(%arg0: i32, %arg1: i32, %arg2: memref<4x8xf32, #tpu.memory_space<vmem>>, %arg3: memref<8x8x4xf32, #tpu.memory_space<vmem>>, %arg4: memref<8x4x4xf32, #tpu.memory_space<vmem>>) attributes {dimension_semantics = [#tpu.dimension_semantics<parallel>, #tpu.dimension_semantics<parallel>], iteration_bounds = array<i64: 4, 1>, scalar_prefetch = 0 : i64, scratch_operands = 0 : i64, tpu.core_type = #tpu.core_type<tc>, window_params = [{pipeline_mode = #tpu.pipeline_mode<synchronous>, transform_indices = @transform_0, window_bounds = array<i64: 4, 8>}, {transform_indices = @transform_1, window_bounds = array<i64: 8, 8, 4>}, {transform_indices = @transform_2, window_bounds = array<i64: 8, 4, 4>}]} {
    %c0 = arith.constant 0 : index
    %c0_0 = arith.constant 0 : index
    %0 = vector.load %arg2[%c0, %c0_0] : memref<4x8xf32, #tpu.memory_space<vmem>>, vector<4x8xf32>
    %c0_1 = arith.constant 0 : index
    %c0_2 = arith.constant 0 : index
    %c0_3 = arith.constant 0 : index
    %1 = vector.load %arg3[%c0_1, %c0_2, %c0_3] : memref<8x8x4xf32, #tpu.memory_space<vmem>>, vector<1x8x4xf32>
    %2 = vector.shape_cast %1 : vector<1x8x4xf32> to vector<8x4xf32>
    %cst = arith.constant dense<0.000000e+00> : vector<4x4xf32>
    %3 = tpu.matmul %0, %2, %cst {dimension_numbers = #tpu.dot_dimension_numbers<[1], [0], [0], [1], [0, 0, 1, 1], [], []>} : vector<4x8xf32>, vector<8x4xf32>, vector<4x4xf32> -> vector<4x4xf32>
    %c0_4 = arith.constant 0 : index
    %c0_5 = arith.constant 0 : index
    %c0_6 = arith.constant 0 : index
    %4 = vector.load %arg4[%c0_4, %c0_5, %c0_6] : memref<8x4x4xf32, #tpu.memory_space<vmem>>, vector<1x4x4xf32>
    %5 = vector.shape_cast %4 : vector<1x4x4xf32> to vector<4x4xf32>
    %6 = vector.shape_cast %3 : vector<4x4xf32> to vector<1x4x4xf32>
    tpu.vector_store %arg4[%c0_4, %c0_5, %c0_6], %6 {strides = array<i32>} : memref<8x4x4xf32, #tpu.memory_space<vmem>>, vector<1x4x4xf32>,
    %c1 = arith.constant 1 : index
    %c0_7 = arith.constant 0 : index
    %c0_8 = arith.constant 0 : index
    %7 = vector.load %arg3[%c1, %c0_7, %c0_8] : memref<8x8x4xf32, #tpu.memory_space<vmem>>, vector<1x8x4xf32>
    %8 = vector.shape_cast %7 : vector<1x8x4xf32> to vector<8x4xf32>
    %cst_9 = arith.constant dense<0.000000e+00> : vector<4x4xf32>
    %9 = tpu.matmul %0, %8, %cst_9 {dimension_numbers = #tpu.dot_dimension_numbers<[1], [0], [0], [1], [0, 0, 1, 1], [], []>} : vector<4x8xf32>, vector<8x4xf32>, vector<4x4xf32> -> vector<4x4xf32>
    %c1_10 = arith.constant 1 : index
    %c0_11 = arith.constant 0 : index
    %c0_12 = arith.constant 0 : index
    %10 = vector.load %arg4[%c1_10, %c0_11, %c0_12] : memref<8x4x4xf32, #tpu.memory_space<vmem>>, vector<1x4x4xf32>
    %11 = vector.shape_cast %10 : vector<1x4x4xf32> to vector<4x4xf32>
    %12 = vector.shape_cast %9 : vector<4x4xf32> to vector<1x4x4xf32>
    tpu.vector_store %arg4[%c1_10, %c0_11, %c0_12], %12 {strides = array<i32>} : memref<8x4x4xf32, #tpu.memory_space<vmem>>, vector<1x4x4xf32>,
    %c2 = arith.constant 2 : index
    %c0_13 = arith.constant 0 : index
    %c0_14 = arith.constant 0 : index
    %13 = vector.load %arg3[%c2, %c0_13, %c0_14] : memref<8x8x4xf32, #tpu.memory_space<vmem>>, vector<1x8x4xf32>
    %14 = vector.shape_cast %13 : vector<1x8x4xf32> to vector<8x4xf32>
    %cst_15 = arith.constant dense<0.000000e+00> : vector<4x4xf32>
    %15 = tpu.matmul %0, %14, %cst_15 {dimension_numbers = #tpu.dot_dimension_numbers<[1], [0], [0], [1], [0, 0, 1, 1], [], []>} : vector<4x8xf32>, vector<8x4xf32>, vector<4x4xf32> -> vector<4x4xf32>
    %c2_16 = arith.constant 2 : index
    %c0_17 = arith.constant 0 : index
    %c0_18 = arith.constant 0 : index
    %16 = vector.load %arg4[%c2_16, %c0_17, %c0_18] : memref<8x4x4xf32, #tpu.memory_space<vmem>>, vector<1x4x4xf32>
    %17 = vector.shape_cast %16 : vector<1x4x4xf32> to vector<4x4xf32>
    %18 = vector.shape_cast %15 : vector<4x4xf32> to vector<1x4x4xf32>
    tpu.vector_store %arg4[%c2_16, %c0_17, %c0_18], %18 {strides = array<i32>} : memref<8x4x4xf32, #tpu.memory_space<vmem>>, vector<1x4x4xf32>,
    %c3 = arith.constant 3 : index
    %c0_19 = arith.constant 0 : index
    %c0_20 = arith.constant 0 : index
    %19 = vector.load %arg3[%c3, %c0_19, %c0_20] : memref<8x8x4xf32, #tpu.memory_space<vmem>>, vector<1x8x4xf32>
    %20 = vector.shape_cast %19 : vector<1x8x4xf32> to vector<8x4xf32>
    %cst_21 = arith.constant dense<0.000000e+00> : vector<4x4xf32>
    %21 = tpu.matmul %0, %20, %cst_21 {dimension_numbers = #tpu.dot_dimension_numbers<[1], [0], [0], [1], [0, 0, 1, 1], [], []>} : vector<4x8xf32>, vector<8x4xf32>, vector<4x4xf32> -> vector<4x4xf32>
    %c3_22 = arith.constant 3 : index
    %c0_23 = arith.constant 0 : index
    %c0_24 = arith.constant 0 : index
    %22 = vector.load %arg4[%c3_22, %c0_23, %c0_24] : memref<8x4x4xf32, #tpu.memory_space<vmem>>, vector<1x4x4xf32>
    %23 = vector.shape_cast %22 : vector<1x4x4xf32> to vector<4x4xf32>
    %24 = vector.shape_cast %21 : vector<4x4xf32> to vector<1x4x4xf32>
    tpu.vector_store %arg4[%c3_22, %c0_23, %c0_24], %24 {strides = array<i32>} : memref<8x4x4xf32, #tpu.memory_space<vmem>>, vector<1x4x4xf32>,
    %c4 = arith.constant 4 : index
    %c0_25 = arith.constant 0 : index
    %c0_26 = arith.constant 0 : index
    %25 = vector.load %arg3[%c4, %c0_25, %c0_26] : memref<8x8x4xf32, #tpu.memory_space<vmem>>, vector<1x8x4xf32>
    %26 = vector.shape_cast %25 : vector<1x8x4xf32> to vector<8x4xf32>
    %cst_27 = arith.constant dense<0.000000e+00> : vector<4x4xf32>
    %27 = tpu.matmul %0, %26, %cst_27 {dimension_numbers = #tpu.dot_dimension_numbers<[1], [0], [0], [1], [0, 0, 1, 1], [], []>} : vector<4x8xf32>, vector<8x4xf32>, vector<4x4xf32> -> vector<4x4xf32>
    %c4_28 = arith.constant 4 : index
    %c0_29 = arith.constant 0 : index
    %c0_30 = arith.constant 0 : index
    %28 = vector.load %arg4[%c4_28, %c0_29, %c0_30] : memref<8x4x4xf32, #tpu.memory_space<vmem>>, vector<1x4x4xf32>
    %29 = vector.shape_cast %28 : vector<1x4x4xf32> to vector<4x4xf32>
    %30 = vector.shape_cast %27 : vector<4x4xf32> to vector<1x4x4xf32>
    tpu.vector_store %arg4[%c4_28, %c0_29, %c0_30], %30 {strides = array<i32>} : memref<8x4x4xf32, #tpu.memory_space<vmem>>, vector<1x4x4xf32>,
    %c5 = arith.constant 5 : index
    %c0_31 = arith.constant 0 : index
    %c0_32 = arith.constant 0 : index
    %31 = vector.load %arg3[%c5, %c0_31, %c0_32] : memref<8x8x4xf32, #tpu.memory_space<vmem>>, vector<1x8x4xf32>
    %32 = vector.shape_cast %31 : vector<1x8x4xf32> to vector<8x4xf32>
    %cst_33 = arith.constant dense<0.000000e+00> : vector<4x4xf32>
    %33 = tpu.matmul %0, %32, %cst_33 {dimension_numbers = #tpu.dot_dimension_numbers<[1], [0], [0], [1], [0, 0, 1, 1], [], []>} : vector<4x8xf32>, vector<8x4xf32>, vector<4x4xf32> -> vector<4x4xf32>
    %c5_34 = arith.constant 5 : index
    %c0_35 = arith.constant 0 : index
    %c0_36 = arith.constant 0 : index
    %34 = vector.load %arg4[%c5_34, %c0_35, %c0_36] : memref<8x4x4xf32, #tpu.memory_space<vmem>>, vector<1x4x4xf32>
    %35 = vector.shape_cast %34 : vector<1x4x4xf32> to vector<4x4xf32>
    %36 = vector.shape_cast %33 : vector<4x4xf32> to vector<1x4x4xf32>
    tpu.vector_store %arg4[%c5_34, %c0_35, %c0_36], %36 {strides = array<i32>} : memref<8x4x4xf32, #tpu.memory_space<vmem>>, vector<1x4x4xf32>,
    %c6 = arith.constant 6 : index
    %c0_37 = arith.constant 0 : index
    %c0_38 = arith.constant 0 : index
    %37 = vector.load %arg3[%c6, %c0_37, %c0_38] : memref<8x8x4xf32, #tpu.memory_space<vmem>>, vector<1x8x4xf32>
    %38 = vector.shape_cast %37 : vector<1x8x4xf32> to vector<8x4xf32>
    %cst_39 = arith.constant dense<0.000000e+00> : vector<4x4xf32>
    %39 = tpu.matmul %0, %38, %cst_39 {dimension_numbers = #tpu.dot_dimension_numbers<[1], [0], [0], [1], [0, 0, 1, 1], [], []>} : vector<4x8xf32>, vector<8x4xf32>, vector<4x4xf32> -> vector<4x4xf32>
    %c6_40 = arith.constant 6 : index
    %c0_41 = arith.constant 0 : index
    %c0_42 = arith.constant 0 : index
    %40 = vector.load %arg4[%c6_40, %c0_41, %c0_42] : memref<8x4x4xf32, #tpu.memory_space<vmem>>, vector<1x4x4xf32>
    %41 = vector.shape_cast %40 : vector<1x4x4xf32> to vector<4x4xf32>
    %42 = vector.shape_cast %39 : vector<4x4xf32> to vector<1x4x4xf32>
    tpu.vector_store %arg4[%c6_40, %c0_41, %c0_42], %42 {strides = array<i32>} : memref<8x4x4xf32, #tpu.memory_space<vmem>>, vector<1x4x4xf32>,
    %c7 = arith.constant 7 : index
    %c0_43 = arith.constant 0 : index
    %c0_44 = arith.constant 0 : index
    %43 = vector.load %arg3[%c7, %c0_43, %c0_44] : memref<8x8x4xf32, #tpu.memory_space<vmem>>, vector<1x8x4xf32>
    %44 = vector.shape_cast %43 : vector<1x8x4xf32> to vector<8x4xf32>
    %cst_45 = arith.constant dense<0.000000e+00> : vector<4x4xf32>
    %45 = tpu.matmul %0, %44, %cst_45 {dimension_numbers = #tpu.dot_dimension_numbers<[1], [0], [0], [1], [0, 0, 1, 1], [], []>} : vector<4x8xf32>, vector<8x4xf32>, vector<4x4xf32> -> vector<4x4xf32>
    %c7_46 = arith.constant 7 : index
    %c0_47 = arith.constant 0 : index
    %c0_48 = arith.constant 0 : index
    %46 = vector.load %arg4[%c7_46, %c0_47, %c0_48] : memref<8x4x4xf32, #tpu.memory_space<vmem>>, vector<1x4x4xf32>
    %47 = vector.shape_cast %46 : vector<1x4x4xf32> to vector<4x4xf32>
    %48 = vector.shape_cast %45 : vector<4x4xf32> to vector<1x4x4xf32>
    tpu.vector_store %arg4[%c7_46, %c0_47, %c0_48], %48 {strides = array<i32>} : memref<8x4x4xf32, #tpu.memory_space<vmem>>, vector<1x4x4xf32>,
    return
  }
  func.func @transform_0(%arg0: i32, %arg1: i32) -> (i32, i32) {
    %c0_i32 = arith.constant 0 : i32
    %c0_i32_0 = arith.constant 0 : i32
    %c0_i32_1 = arith.constant 0 : i32
    return %c0_i32, %c0_i32_0 : i32, i32
  }
  func.func @transform_1(%arg0: i32, %arg1: i32) -> (i32, i32, i32) {
    %c0_i32 = arith.constant 0 : i32
    %c0_i32_0 = arith.constant 0 : i32
    return %arg0, %c0_i32, %arg1 : i32, i32, i32
  }
  func.func @transform_2(%arg0: i32, %arg1: i32) -> (i32, i32, i32) {
    %c0_i32 = arith.constant 0 : i32
    %c0_i32_0 = arith.constant 0 : i32
    return %arg0, %c0_i32, %arg1 : i32, i32, i32
  }
}

</mosaic_0001>

<bundles_post_ra>
// kernel: resize_pallas.4
= control target key start
LH: loop header
LB: loop body
LE: loop exit
PB: predicated region body
PF: predicated region fallthrough
CT: control target
= control target key end

     0   :  { %v691_v0 = vmov 0.0   ;;  %vm13_vm0 = vcmask 64512   ;;  %vm692_vm1 = vmmov 0   ;;  %vm87_vm2 = vcmask 257024   ;;  %s783_s1 = inlined_call_operand.vmem [shape: f32[8,8,32], index: 1, kind: input, shape index: {}]   ;;  %s784_s0 = inlined_call_operand.vmem [shape: f32[4,8], index: 0, kind: input, shape index: {}]   ;;  %s785_s2 = inlined_call_operand.vmem [shape: f32[8,4,32], index: 2, kind: output, shape index: {}]  }
   0x1   :  { %649 = vmatprep.subr.mxu0 %v691_v0  ;;  %654 = vmatprep.subr.mxu1 %v691_v0  ;;  %v12_v1 = vld [vmem:[%s783_s1] sm:$0xff]  ;;  %v612_v2 = vld [vmem:[%s783_s1 + $0x8] sm:$0xff]  ;;  %v615_v4 = vld [vmem:[%s783_s1 + $0x10] sm:$0xff] }
   0x2   :  { %v11_v3 = vld [vmem:[%s784_s0] sm:$0xf]  ;;  %650 = vmatpush3.msra.mxu0 %v12_v1  ;;  %651 = vmatprep.mubr.msk.f32.mxu0 %vm692_vm1, %v691_v0  ;;  %v618_v5 = vld [vmem:[%s783_s1 + $0x18] sm:$0xff]  ;;  %v624_v7 = vld [vmem:[%s783_s1 + $0x28] sm:$0xff] }
   0x3   :  { %655 = vmatpush3.msra.mxu1 %v612_v2  ;;  %656 = vmatprep.mubr.msk.f32.mxu1 %vm692_vm1, %v691_v0  ;;  %v621_v6 = vld [vmem:[%s783_s1 + $0x20] sm:$0xff]  ;;  %v627_v8 = vld [vmem:[%s783_s1 + $0x30] sm:$0xff]  ;;  %v630_v9 = vld [vmem:[%s783_s1 + $0x38] sm:$0xff] }
   0x4   :  { %652 = vmatmul.mubr.msk.f32.vlgmr.msra.gmra.mrb[0].mxu0 %vm13_vm0, %v11_v3  ;;  %657 = vmatmul.mubr.msk.f32.vlgmr.msra.gmra.mrb[0].mxu1 %vm13_vm0, %v11_v3 }
   0x5   :  { %659 = vmatprep.subr.mxu0 %v691_v0  ;;  %664 = vmatprep.subr.mxu1 %v691_v0 }
   0x6   :  { %660 = vmatpush3.msra.mxu0 %v615_v4  ;;  %665 = vmatpush3.msra.mxu1 %v618_v5 }
   0x7   :  { %661 = vmatprep.mubr.msk.f32.mxu0 %vm692_vm1, %v691_v0  ;;  %666 = vmatprep.mubr.msk.f32.mxu1 %vm692_vm1, %v691_v0 }
   0x8   :  { %662 = vmatmul.mubr.msk.f32.vlgmr.msra.gmra.mrb[2].mxu0 %vm13_vm0, %v11_v3  ;;  %667 = vmatmul.mubr.msk.f32.vlgmr.msra.gmra.mrb[2].mxu1 %vm13_vm0, %v11_v3 }
   0x9   :  { %669 = vmatprep.subr.mxu0 %v691_v0  ;;  %674 = vmatprep.subr.mxu1 %v691_v0 }
   0xa   :  { %670 = vmatpush3.msra.mxu0 %v621_v6  ;;  %675 = vmatpush3.msra.mxu1 %v624_v7 }
   0xb   :  { %671 = vmatprep.mubr.msk.f32.mxu0 %vm692_vm1, %v691_v0  ;;  %676 = vmatprep.mubr.msk.f32.mxu1 %vm692_vm1, %v691_v0 }
   0xc   :  { %672 = vmatmul.mubr.msk.f32.vlgmr.msra.gmra.mrb[4].mxu0 %vm13_vm0, %v11_v3  ;;  %677 = vmatmul.mubr.msk.f32.vlgmr.msra.gmra.mrb[4].mxu1 %vm13_vm0, %v11_v3 }
   0xd   :  { %679 = vmatprep.subr.mxu0 %v691_v0  ;;  %684 = vmatprep.subr.mxu1 %v691_v0 }
   0xe   :  { %680 = vmatpush3.msra.mxu0 %v627_v8  ;;  %685 = vmatpush3.msra.mxu1 %v630_v9 }
   0xf   :  { %681 = vmatprep.mubr.msk.f32.mxu0 %vm692_vm1, %v691_v0  ;;  %686 = vmatprep.mubr.msk.f32.mxu1 %vm692_vm1, %v691_v0 }
  0x10   :  { %682 = vmatmul.mubr.msk.f32.vlgmr.msra.gmra.mrb[6].mxu0 %vm13_vm0, %v11_v3  ;;  %687 = vmatmul.mubr.msk.f32.vlgmr.msra.gmra.mrb[6].mxu1 %vm13_vm0, %v11_v3 }
  0xd7   :  { %v83_v10 = vpop.f32.mrb[0].mxu0  ;;  %v157_v11 = vpop.f32.mrb[0].mxu1 }
  0xd8   :  { %88 = vst.msk [vmem:[%s785_s2] sm:$0xf] %vm87_vm2, %v83_v10  ;;  %614 = vst.msk [vmem:[%s785_s2 + $0x4] sm:$0xf] %vm87_vm2, %v157_v11  ;;  %v653_v12 = vpop.f32.mrb[1].mxu0  ;;  %v658_v13 = vpop.f32.mrb[1].mxu1 }
  0xdb   :  { %v231_v14 = vpop.f32.mrb[2].mxu0  ;;  %v305_v15 = vpop.f32.mrb[2].mxu1 }
  0xdc   :  { %617 = vst.msk [vmem:[%s785_s2 + $0x8] sm:$0xf] %vm87_vm2, %v231_v14  ;;  %620 = vst.msk [vmem:[%s785_s2 + $0xc] sm:$0xf] %vm87_vm2, %v305_v15  ;;  %v663_v16 = vpop.f32.mrb[3].mxu0  ;;  %v668_v17 = vpop.f32.mrb[3].mxu1 }
  0xdf   :  { %v379_v18 = vpop.f32.mrb[4].mxu0  ;;  %v453_v19 = vpop.f32.mrb[4].mxu1 }
  0xe0   :  { %623 = vst.msk [vmem:[%s785_s2 + $0x10] sm:$0xf] %vm87_vm2, %v379_v18  ;;  %626 = vst.msk [vmem:[%s785_s2 + $0x14] sm:$0xf] %vm87_vm2, %v453_v19  ;;  %v673_v20 = vpop.f32.mrb[5].mxu0  ;;  %v678_v21 = vpop.f32.mrb[5].mxu1 }
  0xe3   :  { %v527_v22 = vpop.f32.mrb[6].mxu0  ;;  %v601_v23 = vpop.f32.mrb[6].mxu1 }
  0xe4   :  { %629 = vst.msk [vmem:[%s785_s2 + $0x18] sm:$0xf] %vm87_vm2, %v527_v22  ;;  %632 = vst.msk [vmem:[%s785_s2 + $0x1c] sm:$0xf] %vm87_vm2, %v601_v23  ;;  %v683_v24 = vpop.f32.mrb[7].mxu0  ;;  %v688_v25 = vpop.f32.mrb[7].mxu1 }

// kernel: resize_pallas.3
= control target key start
LH: loop header
LB: loop body
LE: loop exit
PB: predicated region body
PF: predicated region fallthrough
CT: control target
= control target key end

     0   :  { %7 = vsyncpa [#allocation3], 0  ;;  %s994_s9 = smov [#allocation2]   ;;  %s1347_s0 = inlined_call_operand.hbm [shape: f32[512,8], index: 0, kind: input, shape index: {}]   ;;  %s1348_s1 = inlined_call_operand.vmem [shape: f32[8,4], index: 1, kind: input, shape index: {}]   ;;  %s1349_s2 = inlined_call_operand.vmem [shape: f32[512,4], index: 2, kind: output, shape index: {}]  }
   0x1   :  { %s13_s10 = sshll.u32 %s994_s9, 4  ;;  %s970_s13 = scalar_lea.hbm %s1347_s0, 8192  ;;  %s14_s10 = int_to_ptr.vmem [resolvable:$true] %s13_s10 }
   0x2   :  { %p971_p0 = scmp.ne.s32.totalorder %s1347_s0, %s970_s13  ;;  %p974_p1 = scmp.lt.u32.totalorder %s970_s13, %s1347_s0 }
   0x4   :  { %p976_p2 = pnand %p974_p1, %p971_p0 }
   0x6   :  { %979 = shalt.err (!%p976_p2)
}
   0x7   :  { %s980_s18 = scalar_lea.vmem %s14_s10, 8192  ;;  %p985_p4 = scmp.lt.s32.totalorder %s14_s10, %s14_s10 }
   0x8   :  { %p981_p3 = scmp.ne.s32.totalorder %s14_s10, %s980_s18  ;;  %p986_p5 = scmp.lt.s32.totalorder %s980_s18, %s980_s18 }
   0xa   :  { %p987_p6 = por %p986_p5, %p985_p4 }
   0xc   :  { %p988_p7 = pnand %p987_p6, %p981_p3 }
   0xe   :  { %991 = shalt.err (!%p988_p7)
}
   0xf   :  { %s995_s19 = smov 128   ;;  %s996_s20 = smov 8  }
  0x10   :  { %19 = dma.hbm_to_vmem [thread:$0]  %s1347_s0, 8192, %s14_s10, [#allocation3], %s995_s19, %s995_s19, %s996_s20  }
  0x11   :  { %992 = dma.done.wait [#allocation3], 8192  }
  0x12   :  { %993 = vsyncadd [#allocation3], 4294959104  ;;  %v89_v0 = vld [vmem:[%s1348_s1] sm:$0xff]  ;;  %vm90_vm0 = vcmask 64512   ;;  %v26_v3 = vld [vmem:[#allocation2 + $0x8] sm:$0xff]  ;;  %vm668_vm1 = vcmask 31744  }
  0x13   :  { %v25_v1 = vld [vmem:[#allocation2] sm:$0xff]  ;;  %867 = vmatprep.subr.mxu0 %v89_v0  ;;  %965 = vmatprep.subr.mxu1 %v89_v0  ;;  %v58_v4 = vld [vmem:[#allocation2 + $0x108] sm:$0xff]  ;;  %v27_v5 = vld [vmem:[#allocation2 + $0x10] sm:$0xff] }
  0x14   :  { %v57_v2 = vld [vmem:[#allocation2 + $0x100] sm:$0xff]  ;;  %868 = vmatpush3.msra.mxu0 %v89_v0  ;;  %966 = vmatpush3.msra.mxu1 %v89_v0  ;;  %v59_v6 = vld [vmem:[#allocation2 + $0x110] sm:$0xff]  ;;  %v28_v7 = vld [vmem:[#allocation2 + $0x18] sm:$0xff] }
  0x15   :  { %869 = vmatprep.mubr.msk.f32.mxu0 %vm90_vm0, %v25_v1  ;;  %917 = vmatprep.mubr.msk.f32.mxu1 %vm90_vm0, %v57_v2  ;;  %v60_v8 = vld [vmem:[#allocation2 + $0x118] sm:$0xff]  ;;  %v29_v9 = vld [vmem:[#allocation2 + $0x20] sm:$0xff]  ;;  %v30_v11 = vld [vmem:[#allocation2 + $0x28] sm:$0xff] }
  0x16   :  { %870 = vmatmul.mubr.msk.f32.vlgmr.msra.gmra.mrb[0].mxu0 %vm90_vm0, %v26_v3  ;;  %918 = vmatmul.mubr.msk.f32.vlgmr.msra.gmra.mrb[0].mxu1 %vm90_vm0, %v58_v4  ;;  %v61_v10 = vld [vmem:[#allocation2 + $0x120] sm:$0xff]  ;;  %v62_v12 = vld [vmem:[#allocation2 + $0x128] sm:$0xff]  ;;  %v31_v13 = vld [vmem:[#allocation2 + $0x30] sm:$0xff] }
  0x17   :  { %872 = vmatprep.mubr.msk.f32.mxu0 %vm90_vm0, %v27_v5  ;;  %920 = vmatprep.mubr.msk.f32.mxu1 %vm90_vm0, %v59_v6  ;;  %v63_v14 = vld [vmem:[#allocation2 + $0x130] sm:$0xff]  ;;  %v32_v15 = vld [vmem:[#allocation2 + $0x38] sm:$0xff]  ;;  %v33_v17 = vld [vmem:[#allocation2 + $0x40] sm:$0xff] }
  0x18   :  { %v64_v16 = vld [vmem:[#allocation2 + $0x138] sm:$0xff]  ;;  %v65_v18 = vld [vmem:[#allocation2 + $0x140] sm:$0xff]  ;;  %v34_v19 = vld [vmem:[#allocation2 + $0x48] sm:$0xff] }
  0x19   :  { %v66_v20 = vld [vmem:[#allocation2 + $0x148] sm:$0xff]  ;;  %v35_v21 = vld [vmem:[#allocation2 + $0x50] sm:$0xff]  ;;  %v36_v23 = vld [vmem:[#allocation2 + $0x58] sm:$0xff] }
  0x1a   :  { %873 = vmatmul.mubr.msk.f32.gmra.mrb[2].mxu0 %vm90_vm0, %v28_v7  ;;  %921 = vmatmul.mubr.msk.f32.gmra.mrb[2].mxu1 %vm90_vm0, %v60_v8  ;;  %v67_v22 = vld [vmem:[#allocation2 + $0x150] sm:$0xff]  ;;  %v68_v24 = vld [vmem:[#allocation2 + $0x158] sm:$0xff]  ;;  %v37_v25 = vld [vmem:[#allocation2 + $0x60] sm:$0xff] }
  0x1b   :  { %875 = vmatprep.mubr.msk.f32.mxu0 %vm90_vm0, %v29_v9  ;;  %923 = vmatprep.mubr.msk.f32.mxu1 %vm90_vm0, %v61_v10  ;;  %v69_v26 = vld [vmem:[#allocation2 + $0x160] sm:$0xff]  ;;  %v38_v27 = vld [vmem:[#allocation2 + $0x68] sm:$0xff]  ;;  %v39_v29 = vld [vmem:[#allocation2 + $0x70] sm:$0xff] }
  0x1c   :  { %v70_v28 = vld [vmem:[#allocation2 + $0x168] sm:$0xff]  ;;  %v71_v30 = vld [vmem:[#allocation2 + $0x170] sm:$0xff]  ;;  %v40_v31 = vld [vmem:[#allocation2 + $0x78] sm:$0xff] }
  0x1d   :  { %v72_v32 = vld [vmem:[#allocation2 + $0x178] sm:$0xff]  ;;  %v41_v33 = vld [vmem:[#allocation2 + $0x80] sm:$0xff]  ;;  %v42_v35 = vld [vmem:[#allocation2 + $0x88] sm:$0xff] }
  0x1e   :  { %876 = vmatmul.mubr.msk.f32.gmra.mrb[4].mxu0 %vm90_vm0, %v30_v11  ;;  %924 = vmatmul.mubr.msk.f32.gmra.mrb[4].mxu1 %vm90_vm0, %v62_v12  ;;  %v73_v34 = vld [vmem:[#allocation2 + $0x180] sm:$0xff]  ;;  %v74_v36 = vld [vmem:[#allocation2 + $0x188] sm:$0xff]  ;;  %v43_v37 = vld [vmem:[#allocation2 + $0x90] sm:$0xff] }
  0x1f   :  { %878 = vmatprep.mubr.msk.f32.mxu0 %vm90_vm0, %v31_v13  ;;  %926 = vmatprep.mubr.msk.f32.mxu1 %vm90_vm0, %v63_v14  ;;  %v75_v38 = vld [vmem:[#allocation2 + $0x190] sm:$0xff]  ;;  %v44_v39 = vld [vmem:[#allocation2 + $0x98] sm:$0xff]  ;;  %v45_v41 = vld [vmem:[#allocation2 + $0xa0] sm:$0xff] }
  0x20   :  { %v76_v40 = vld [vmem:[#allocation2 + $0x198] sm:$0xff]  ;;  %v77_v42 = vld [vmem:[#allocation2 + $0x1a0] sm:$0xff]  ;;  %v46_v43 = vld [vmem:[#allocation2 + $0xa8] sm:$0xff] }
  0x21   :  { %v78_v44 = vld [vmem:[#allocation2 + $0x1a8] sm:$0xff]  ;;  %v47_v45 = vld [vmem:[#allocation2 + $0xb0] sm:$0xff]  ;;  %v48_v47 = vld [vmem:[#allocation2 + $0xb8] sm:$0xff] }
  0x22   :  { %879 = vmatmul.mubr.msk.f32.gmra.mrb[6].mxu0 %vm90_vm0, %v32_v15  ;;  %927 = vmatmul.mubr.msk.f32.gmra.mrb[6].mxu1 %vm90_vm0, %v64_v16  ;;  %v79_v46 = vld [vmem:[#allocation2 + $0x1b0] sm:$0xff]  ;;  %v80_v48 = vld [vmem:[#allocation2 + $0x1b8] sm:$0xff]  ;;  %v49_v49 = vld [vmem:[#allocation2 + $0xc0] sm:$0xff] }
  0x23   :  { %881 = vmatprep.mubr.msk.f32.mxu0 %vm90_vm0, %v33_v17  ;;  %929 = vmatprep.mubr.msk.f32.mxu1 %vm90_vm0, %v65_v18  ;;  %v81_v50 = vld [vmem:[#allocation2 + $0x1c0] sm:$0xff]  ;;  %v50_v51 = vld [vmem:[#allocation2 + $0xc8] sm:$0xff]  ;;  %v51_v53 = vld [vmem:[#allocation2 + $0xd0] sm:$0xff] }
  0x24   :  { %v82_v52 = vld [vmem:[#allocation2 + $0x1c8] sm:$0xff]  ;;  %v83_v54 = vld [vmem:[#allocation2 + $0x1d0] sm:$0xff]  ;;  %v52_v55 = vld [vmem:[#allocation2 + $0xd8] sm:$0xff] }
  0x25   :  { %v84_v56 = vld [vmem:[#allocation2 + $0x1d8] sm:$0xff]  ;;  %v53_v57 = vld [vmem:[#allocation2 + $0xe0] sm:$0xff]  ;;  %v54_v59 = vld [vmem:[#allocation2 + $0xe8] sm:$0xff] }
  0x26   :  { %882 = vmatmul.mubr.msk.f32.gmra.mrb[8].mxu0 %vm90_vm0, %v34_v19  ;;  %930 = vmatmul.mubr.msk.f32.gmra.mrb[8].mxu1 %vm90_vm0, %v66_v20  ;;  %v85_v58 = vld [vmem:[#allocation2 + $0x1e0] sm:$0xff]  ;;  %v86_v60 = vld [vmem:[#allocation2 + $0x1e8] sm:$0xff]  ;;  %v55_v61 = vld [vmem:[#allocation2 + $0xf0] sm:$0xff] }
  0x27   :  { %884 = vmatprep.mubr.msk.f32.mxu0 %vm90_vm0, %v35_v21  ;;  %932 = vmatprep.mubr.msk.f32.mxu1 %vm90_vm0, %v67_v22  ;;  %v87_v62 = vld [vmem:[#allocation2 + $0x1f0] sm:$0xff]  ;;  %v56_v63 = vld [vmem:[#allocation2 + $0xf8] sm:$0xff] }
  0x28   :  { %v88_v0 = vld [vmem:[#allocation2 + $0x1f8] sm:$0xff] }
  0x2a   :  { %885 = vmatmul.mubr.msk.f32.gmra.mrb[10].mxu0 %vm90_vm0, %v36_v23  ;;  %933 = vmatmul.mubr.msk.f32.gmra.mrb[10].mxu1 %vm90_vm0, %v68_v24 }
  0x2b   :  { %887 = vmatprep.mubr.msk.f32.mxu0 %vm90_vm0, %v37_v25  ;;  %935 = vmatprep.mubr.msk.f32.mxu1 %vm90_vm0, %v69_v26 }
  0x2e   :  { %888 = vmatmul.mubr.msk.f32.gmra.mrb[12].mxu0 %vm90_vm0, %v38_v27  ;;  %936 = vmatmul.mubr.msk.f32.gmra.mrb[12].mxu1 %vm90_vm0, %v70_v28 }
  0x2f   :  { %890 = vmatprep.mubr.msk.f32.mxu0 %vm90_vm0, %v39_v29  ;;  %938 = vmatprep.mubr.msk.f32.mxu1 %vm90_vm0, %v71_v30 }
  0x32   :  { %891 = vmatmul.mubr.msk.f32.gmra.mrb[14].mxu0 %vm90_vm0, %v40_v31  ;;  %939 = vmatmul.mubr.msk.f32.gmra.mrb[14].mxu1 %vm90_vm0, %v72_v32 }
  0x33   :  { %893 = vmatprep.mubr.msk.f32.mxu0 %vm90_vm0, %v41_v33  ;;  %941 = vmatprep.mubr.msk.f32.mxu1 %vm90_vm0, %v73_v34 }
  0x36   :  { %894 = vmatmul.mubr.msk.f32.gmra.mrb[16].mxu0 %vm90_vm0, %v42_v35  ;;  %942 = vmatmul.mubr.msk.f32.gmra.mrb[16].mxu1 %vm90_vm0, %v74_v36 }
  0x37   :  { %896 = vmatprep.mubr.msk.f32.mxu0 %vm90_vm0, %v43_v37  ;;  %944 = vmatprep.mubr.msk.f32.mxu1 %vm90_vm0, %v75_v38 }
  0x3a   :  { %897 = vmatmul.mubr.msk.f32.gmra.mrb[18].mxu0 %vm90_vm0, %v44_v39  ;;  %945 = vmatmul.mubr.msk.f32.gmra.mrb[18].mxu1 %vm90_vm0, %v76_v40 }
  0x3b   :  { %899 = vmatprep.mubr.msk.f32.mxu0 %vm90_vm0, %v45_v41  ;;  %947 = vmatprep.mubr.msk.f32.mxu1 %vm90_vm0, %v77_v42 }
  0x3e   :  { %900 = vmatmul.mubr.msk.f32.gmra.mrb[20].mxu0 %vm90_vm0, %v46_v43  ;;  %948 = vmatmul.mubr.msk.f32.gmra.mrb[20].mxu1 %vm90_vm0, %v78_v44 }
  0x3f   :  { %902 = vmatprep.mubr.msk.f32.mxu0 %vm90_vm0, %v47_v45  ;;  %950 = vmatprep.mubr.msk.f32.mxu1 %vm90_vm0, %v79_v46 }
  0x42   :  { %903 = vmatmul.mubr.msk.f32.gmra.mrb[22].mxu0 %vm90_vm0, %v48_v47  ;;  %951 = vmatmul.mubr.msk.f32.gmra.mrb[22].mxu1 %vm90_vm0, %v80_v48 }
  0x43   :  { %905 = vmatprep.mubr.msk.f32.mxu0 %vm90_vm0, %v49_v49  ;;  %953 = vmatprep.mubr.msk.f32.mxu1 %vm90_vm0, %v81_v50 }
  0x46   :  { %906 = vmatmul.mubr.msk.f32.gmra.mrb[24].mxu0 %vm90_vm0, %v50_v51  ;;  %954 = vmatmul.mubr.msk.f32.gmra.mrb[24].mxu1 %vm90_vm0, %v82_v52 }
  0x47   :  { %908 = vmatprep.mubr.msk.f32.mxu0 %vm90_vm0, %v51_v53  ;;  %956 = vmatprep.mubr.msk.f32.mxu1 %vm90_vm0, %v83_v54 }
  0x4a   :  { %909 = vmatmul.mubr.msk.f32.gmra.mrb[26].mxu0 %vm90_vm0, %v52_v55  ;;  %957 = vmatmul.mubr.msk.f32.gmra.mrb[26].mxu1 %vm90_vm0, %v84_v56 }
  0x4b   :  { %911 = vmatprep.mubr.msk.f32.mxu0 %vm90_vm0, %v53_v57  ;;  %959 = vmatprep.mubr.msk.f32.mxu1 %vm90_vm0, %v85_v58 }
  0x4e   :  { %912 = vmatmul.mubr.msk.f32.gmra.mrb[28].mxu0 %vm90_vm0, %v54_v59  ;;  %960 = vmatmul.mubr.msk.f32.gmra.mrb[28].mxu1 %vm90_vm0, %v86_v60 }
  0x4f   :  { %914 = vmatprep.mubr.msk.f32.mxu0 %vm90_vm0, %v55_v61  ;;  %962 = vmatprep.mubr.msk.f32.mxu1 %vm90_vm0, %v87_v62 }
  0x52   :  { %915 = vmatmul.mubr.msk.f32.gmra.mrb[30].mxu0 %vm90_vm0, %v56_v63  ;;  %963 = vmatmul.mubr.msk.f32.gmra.mrb[30].mxu1 %vm90_vm0, %v88_v0 }
  0xe9   :  { %v871_v1 = vpop.f32.mrb[0].mxu0  ;;  %v919_v2 = vpop.f32.mrb[0].mxu1 }
  0xea   :  { %670 = vst.msk [vmem:[%s1349_s2 + $0x8] sm:$0xff] %vm668_vm1, %v871_v1  ;;  %702 = vst.msk [vmem:[%s1349_s2 + $0x108] sm:$0xff] %vm668_vm1, %v919_v2  ;;  %v349_v3 = vpop.f32.mrb[1].mxu0  ;;  %v509_v4 = vpop.f32.mrb[1].mxu1 }
  0xeb   :  { %669 = vst.msk [vmem:[%s1349_s2] sm:$0xff] %vm668_vm1, %v349_v3  ;;  %701 = vst.msk [vmem:[%s1349_s2 + $0x100] sm:$0xff] %vm668_vm1, %v509_v4 }
  0xed   :  { %v874_v5 = vpop.f32.mrb[2].mxu0  ;;  %v922_v6 = vpop.f32.mrb[2].mxu1 }
  0xee   :  { %672 = vst.msk [vmem:[%s1349_s2 + $0x18] sm:$0xff] %vm668_vm1, %v874_v5  ;;  %704 = vst.msk [vmem:[%s1349_s2 + $0x118] sm:$0xff] %vm668_vm1, %v922_v6  ;;  %v359_v7 = vpop.f32.mrb[3].mxu0  ;;  %v519_v8 = vpop.f32.mrb[3].mxu1 }
  0xef   :  { %671 = vst.msk [vmem:[%s1349_s2 + $0x10] sm:$0xff] %vm668_vm1, %v359_v7  ;;  %703 = vst.msk [vmem:[%s1349_s2 + $0x110] sm:$0xff] %vm668_vm1, %v519_v8 }
  0xf1   :  { %v877_v9 = vpop.f32.mrb[4].mxu0  ;;  %v925_v10 = vpop.f32.mrb[4].mxu1 }
  0xf2   :  { %674 = vst.msk [vmem:[%s1349_s2 + $0x28] sm:$0xff] %vm668_vm1, %v877_v9  ;;  %706 = vst.msk [vmem:[%s1349_s2 + $0x128] sm:$0xff] %vm668_vm1, %v925_v10  ;;  %v369_v11 = vpop.f32.mrb[5].mxu0  ;;  %v529_v12 = vpop.f32.mrb[5].mxu1 }
  0xf3   :  { %673 = vst.msk [vmem:[%s1349_s2 + $0x20] sm:$0xff] %vm668_vm1, %v369_v11  ;;  %705 = vst.msk [vmem:[%s1349_s2 + $0x120] sm:$0xff] %vm668_vm1, %v529_v12 }
  0xf5   :  { %v880_v13 = vpop.f32.mrb[6].mxu0  ;;  %v928_v14 = vpop.f32.mrb[6].mxu1 }
  0xf6   :  { %676 = vst.msk [vmem:[%s1349_s2 + $0x38] sm:$0xff] %vm668_vm1, %v880_v13  ;;  %708 = vst.msk [vmem:[%s1349_s2 + $0x138] sm:$0xff] %vm668_vm1, %v928_v14  ;;  %v379_v15 = vpop.f32.mrb[7].mxu0  ;;  %v539_v16 = vpop.f32.mrb[7].mxu1 }
  0xf7   :  { %675 = vst.msk [vmem:[%s1349_s2 + $0x30] sm:$0xff] %vm668_vm1, %v379_v15  ;;  %707 = vst.msk [vmem:[%s1349_s2 + $0x130] sm:$0xff] %vm668_vm1, %v539_v16 }
  0xf9   :  { %v883_v17 = vpop.f32.mrb[8].mxu0  ;;  %v931_v18 = vpop.f32.mrb[8].mxu1 }
  0xfa   :  { %678 = vst.msk [vmem:[%s1349_s2 + $0x48] sm:$0xff] %vm668_vm1, %v883_v17  ;;  %710 = vst.msk [vmem:[%s1349_s2 + $0x148] sm:$0xff] %vm668_vm1, %v931_v18  ;;  %v389_v19 = vpop.f32.mrb[9].mxu0  ;;  %v549_v20 = vpop.f32.mrb[9].mxu1 }
  0xfb   :  { %677 = vst.msk [vmem:[%s1349_s2 + $0x40] sm:$0xff] %vm668_vm1, %v389_v19  ;;  %709 = vst.msk [vmem:[%s1349_s2 + $0x140] sm:$0xff] %vm668_vm1, %v549_v20 }
  0xfd   :  { %v886_v21 = vpop.f32.mrb[10].mxu0  ;;  %v934_v22 = vpop.f32.mrb[10].mxu1 }
  0xfe   :  { %680 = vst.msk [vmem:[%s1349_s2 + $0x58] sm:$0xff] %vm668_vm1, %v886_v21  ;;  %712 = vst.msk [vmem:[%s1349_s2 + $0x158] sm:$0xff] %vm668_vm1, %v934_v22  ;;  %v399_v23 = vpop.f32.mrb[11].mxu0  ;;  %v559_v24 = vpop.f32.mrb[11].mxu1 }
  0xff   :  { %679 = vst.msk [vmem:[%s1349_s2 + $0x50] sm:$0xff] %vm668_vm1, %v399_v23  ;;  %711 = vst.msk [vmem:[%s1349_s2 + $0x150] sm:$0xff] %vm668_vm1, %v559_v24 }
 0x101   :  { %v889_v25 = vpop.f32.mrb[12].mxu0  ;;  %v937_v26 = vpop.f32.mrb[12].mxu1 }
 0x102   :  { %682 = vst.msk [vmem:[%s1349_s2 + $0x68] sm:$0xff] %vm668_vm1, %v889_v25  ;;  %714 = vst.msk [vmem:[%s1349_s2 + $0x168] sm:$0xff] %vm668_vm1, %v937_v26  ;;  %v409_v27 = vpop.f32.mrb[13].mxu0  ;;  %v569_v28 = vpop.f32.mrb[13].mxu1 }
 0x103   :  { %681 = vst.msk [vmem:[%s1349_s2 + $0x60] sm:$0xff] %vm668_vm1, %v409_v27  ;;  %713 = vst.msk [vmem:[%s1349_s2 + $0x160] sm:$0xff] %vm668_vm1, %v569_v28 }
 0x105   :  { %v892_v29 = vpop.f32.mrb[14].mxu0  ;;  %v940_v30 = vpop.f32.mrb[14].mxu1 }
 0x106   :  { %684 = vst.msk [vmem:[%s1349_s2 + $0x78] sm:$0xff] %vm668_vm1, %v892_v29  ;;  %716 = vst.msk [vmem:[%s1349_s2 + $0x178] sm:$0xff] %vm668_vm1, %v940_v30  ;;  %v419_v31 = vpop.f32.mrb[15].mxu0  ;;  %v579_v32 = vpop.f32.mrb[15].mxu1 }
 0x107   :  { %683 = vst.msk [vmem:[%s1349_s2 + $0x70] sm:$0xff] %vm668_vm1, %v419_v31  ;;  %715 = vst.msk [vmem:[%s1349_s2 + $0x170] sm:$0xff] %vm668_vm1, %v579_v32 }
 0x109   :  { %v895_v33 = vpop.f32.mrb[16].mxu0  ;;  %v943_v34 = vpop.f32.mrb[16].mxu1 }
 0x10a   :  { %686 = vst.msk [vmem:[%s1349_s2 + $0x88] sm:$0xff] %vm668_vm1, %v895_v33  ;;  %718 = vst.msk [vmem:[%s1349_s2 + $0x188] sm:$0xff] %vm668_vm1, %v943_v34  ;;  %v429_v35 = vpop.f32.mrb[17].mxu0  ;;  %v589_v36 = vpop.f32.mrb[17].mxu1 }
 0x10b   :  { %685 = vst.msk [vmem:[%s1349_s2 + $0x80] sm:$0xff] %vm668_vm1, %v429_v35  ;;  %717 = vst.msk [vmem:[%s1349_s2 + $0x180] sm:$0xff] %vm668_vm1, %v589_v36 }
 0x10d   :  { %v898_v37 = vpop.f32.mrb[18].mxu0  ;;  %v946_v38 = vpop.f32.mrb[18].mxu1 }
 0x10e   :  { %688 = vst.msk [vmem:[%s1349_s2 + $0x98] sm:$0xff] %vm668_vm1, %v898_v37  ;;  %720 = vst.msk [vmem:[%s1349_s2 + $0x198] sm:$0xff] %vm668_vm1, %v946_v38  ;;  %v439_v39 = vpop.f32.mrb[19].mxu0  ;;  %v599_v40 = vpop.f32.mrb[19].mxu1 }
 0x10f   :  { %687 = vst.msk [vmem:[%s1349_s2 + $0x90] sm:$0xff] %vm668_vm1, %v439_v39  ;;  %719 = vst.msk [vmem:[%s1349_s2 + $0x190] sm:$0xff] %vm668_vm1, %v599_v40 }
 0x111   :  { %v901_v41 = vpop.f32.mrb[20].mxu0  ;;  %v949_v42 = vpop.f32.mrb[20].mxu1 }
 0x112   :  { %690 = vst.msk [vmem:[%s1349_s2 + $0xa8] sm:$0xff] %vm668_vm1, %v901_v41  ;;  %722 = vst.msk [vmem:[%s1349_s2 + $0x1a8] sm:$0xff] %vm668_vm1, %v949_v42  ;;  %v449_v43 = vpop.f32.mrb[21].mxu0  ;;  %v609_v44 = vpop.f32.mrb[21].mxu1 }
 0x113   :  { %689 = vst.msk [vmem:[%s1349_s2 + $0xa0] sm:$0xff] %vm668_vm1, %v449_v43  ;;  %721 = vst.msk [vmem:[%s1349_s2 + $0x1a0] sm:$0xff] %vm668_vm1, %v609_v44 }
 0x115   :  { %v904_v45 = vpop.f32.mrb[22].mxu0  ;;  %v952_v46 = vpop.f32.mrb[22].mxu1 }
 0x116   :  { %692 = vst.msk [vmem:[%s1349_s2 + $0xb8] sm:$0xff] %vm668_vm1, %v904_v45  ;;  %724 = vst.msk [vmem:[%s1349_s2 + $0x1b8] sm:$0xff] %vm668_vm1, %v952_v46  ;;  %v459_v47 = vpop.f32.mrb[23].mxu0  ;;  %v619_v48 = vpop.f32.mrb[23].mxu1 }
 0x117   :  { %691 = vst.msk [vmem:[%s1349_s2 + $0xb0] sm:$0xff] %vm668_vm1, %v459_v47  ;;  %723 = vst.msk [vmem:[%s1349_s2 + $0x1b0] sm:$0xff] %vm668_vm1, %v619_v48 }
 0x119   :  { %v907_v49 = vpop.f32.mrb[24].mxu0  ;;  %v955_v50 = vpop.f32.mrb[24].mxu1 }
 0x11a   :  { %694 = vst.msk [vmem:[%s1349_s2 + $0xc8] sm:$0xff] %vm668_vm1, %v907_v49  ;;  %726 = vst.msk [vmem:[%s1349_s2 + $0x1c8] sm:$0xff] %vm668_vm1, %v955_v50  ;;  %v469_v51 = vpop.f32.mrb[25].mxu0  ;;  %v629_v52 = vpop.f32.mrb[25].mxu1 }
 0x11b   :  { %693 = vst.msk [vmem:[%s1349_s2 + $0xc0] sm:$0xff] %vm668_vm1, %v469_v51  ;;  %725 = vst.msk [vmem:[%s1349_s2 + $0x1c0] sm:$0xff] %vm668_vm1, %v629_v52 }
 0x11d   :  { %v910_v53 = vpop.f32.mrb[26].mxu0  ;;  %v958_v54 = vpop.f32.mrb[26].mxu1 }
 0x11e   :  { %696 = vst.msk [vmem:[%s1349_s2 + $0xd8] sm:$0xff] %vm668_vm1, %v910_v53  ;;  %728 = vst.msk [vmem:[%s1349_s2 + $0x1d8] sm:$0xff] %vm668_vm1, %v958_v54  ;;  %v479_v55 = vpop.f32.mrb[27].mxu0  ;;  %v639_v56 = vpop.f32.mrb[27].mxu1 }
 0x11f   :  { %695 = vst.msk [vmem:[%s1349_s2 + $0xd0] sm:$0xff] %vm668_vm1, %v479_v55  ;;  %727 = vst.msk [vmem:[%s1349_s2 + $0x1d0] sm:$0xff] %vm668_vm1, %v639_v56 }
 0x121   :  { %v913_v57 = vpop.f32.mrb[28].mxu0  ;;  %v961_v58 = vpop.f32.mrb[28].mxu1 }
 0x122   :  { %698 = vst.msk [vmem:[%s1349_s2 + $0xe8] sm:$0xff] %vm668_vm1, %v913_v57  ;;  %730 = vst.msk [vmem:[%s1349_s2 + $0x1e8] sm:$0xff] %vm668_vm1, %v961_v58  ;;  %v489_v59 = vpop.f32.mrb[29].mxu0  ;;  %v649_v60 = vpop.f32.mrb[29].mxu1 }
 0x123   :  { %697 = vst.msk [vmem:[%s1349_s2 + $0xe0] sm:$0xff] %vm668_vm1, %v489_v59  ;;  %729 = vst.msk [vmem:[%s1349_s2 + $0x1e0] sm:$0xff] %vm668_vm1, %v649_v60 }
 0x125   :  { %v916_v61 = vpop.f32.mrb[30].mxu0  ;;  %v964_v62 = vpop.f32.mrb[30].mxu1 }
 0x126   :  { %700 = vst.msk [vmem:[%s1349_s2 + $0xf8] sm:$0xff] %vm668_vm1, %v916_v61  ;;  %732 = vst.msk [vmem:[%s1349_s2 + $0x1f8] sm:$0xff] %vm668_vm1, %v964_v62  ;;  %v499_v63 = vpop.f32.mrb[31].mxu0  ;;  %v659_v0 = vpop.f32.mrb[31].mxu1 }
 0x127   :  { %699 = vst.msk [vmem:[%s1349_s2 + $0xf0] sm:$0xff] %vm668_vm1, %v499_v63  ;;  %731 = vst.msk [vmem:[%s1349_s2 + $0x1f0] sm:$0xff] %vm668_vm1, %v659_v0 }
 0x128   :  { %737 = vsyncpa [#allocation3], 1 }

// kernel: resize_pallas.5
= control target key start
LH: loop header
LB: loop body
LE: loop exit
PB: predicated region body
PF: predicated region fallthrough
CT: control target
= control target key end

     0   :  { %7 = vsyncpa [#allocation3], 0  ;;  %s1252_s0 = inlined_call_operand.vmem [shape: f32[4,8], index: 0, kind: input, shape index: {}]   ;;  %s1253_s1 = inlined_call_operand.vmem [shape: f32[32,8,4], index: 1, kind: input, shape index: {}]   ;;  %s1254_s2 = inlined_call_operand.hbm [shape: f32[32,4,4], index: 2, kind: output, shape index: {}]  }
   0x1   :  { %9 = vsyncpa [#allocation3 + $0x1], 0  ;;  %s1107_s9 = smov 0   ;;  %s1109_s10 = smov 0  }
   0x2   :  { %s1111_s11 = smov 0   ;;  %s1113_s12 = smov 0  }
   0x3   :  { %s1115_s13 = smov 0   ;;  %s1117_s14 = smov 0  }
   0x4 LB: > { %s856_s15 = sadd.s32 4294967295, %s1085_s14   ;;  %s857_s16 = sadd.s32 4294967294, %s1085_s14   ;;  %s1085_s14 = sphi %s1117_s14, %s15_s14   ;;  %s1081_s13 = sphi %s1115_s13, %s1261_s13   ;;  %s1077_s12 = sphi %s1113_s12, %s1260_s12   ;;  %s1073_s11 = sphi %s1111_s11, %s1259_s11   ;;  %s1069_s10 = sphi %s1109_s10, %s1258_s10   ;;  %s1065_s9 = sphi %s1107_s9, %s1257_s9  }
   0x5   : > { %s27_s17 = sadd.s32 1, %s1081_s13  ;;  %s85_s18 = sadd.s32 1, %s1073_s11 }
   0x6   : > { %p29_p0 = scmp.ge.s32.totalorder %s27_s17, 4  ;;  %p95_p1 = scmp.ne.s32.totalorder %s1073_s11, %s1069_s10 }
   0x7   : > { %p96_p2 = scmp.eq.s32.totalorder %s856_s15, 3  ;;  %p101_p3 = scmp.ne.s32.totalorder %s1069_s10, %s1065_s9 }
   0x8   : > { %s1263_s17 = smov (%p29_p0, %s27_s17), 0  ;;  %p102_p5 = scmp.eq.s32.totalorder %s857_s16, 3 }
   0x9   : > { %p1147_p4 = por %p96_p2, %p95_p1  ;;  %s80_s20 = ssub.s32 %s1081_s13, %s1263_s17 }
   0xa   : > { %p860_p6 = scmp.ge.s32.totalorder %s1085_s14, 1  ;;  %p83_p7 = scmp.eq.s32.totalorder %s80_s20, 0 }
   0xb   : > { %p1154_p8 = por %p102_p5, %p101_p3  ;;  %p135_p9 = scmp.lt.s32.totalorder %s1085_s14, 5 }
   0xc   : > { %s1160_s22 = scalar_select %p83_p7, %s1073_s11, %s85_s18  }
   0xd   : > { %p136_p10 = pnand %p860_p6, %p135_p9 }
   0xe   : > { %s862_s23 = sshll.u32 (!%p136_p10), %s1077_s12, 3  ;;  %v1087_v0 = vmov (!%p136_p10), 0.0   ;;  %vm1088_vm0 = vmmov (!%p136_p10), 0   ;;  %v170_v1 = vld [vmem:[%s1252_s0] sm:$0xf] (!%p136_p10)  ;;  %vm172_vm1 = vcmask (!%p136_p10), 64512  }
   0xf   : > { %139 = sbr.rel (%p136_p10) target bundleno = 266 (0x10a), region = 28  ;;  %908 = vmatprep.subr.mxu0 (!%p136_p10), %v1087_v0  ;;  %913 = vmatprep.subr.mxu1 (!%p136_p10), %v1087_v0  ;;  %p161_p11 = scmp.lt.s32.totalorder (!%p136_p10), %s862_s23, 31  ;;  %vm246_vm2 = vcmask (!%p136_p10), 27648  }
  0x10   : > { %910 = vmatprep.mubr.msk.f32.mxu0 (!%p136_p10), %vm1088_vm0, %v1087_v0  ;;  %915 = vmatprep.mubr.msk.f32.mxu1 (!%p136_p10), %vm1088_vm0, %v1087_v0  ;;  %s157_s30 = sand.u32 (!%p136_p10), 1, %s1069_s10   ;;  %s891_s5 = sshll.u32 (!%p136_p10), %s1077_s12, 9 }
  0x11   : > { %s861_s3 = sshll.u32 (!%p136_p10), %s157_s30, 5  ;;  %s1198_s15 = scalar_lea.hbm (!%p136_p10), %s1254_s2, %s891_s5 }
  0x12   : > { %s159_s4 = scalar_lea.vmem (!%p136_p10), [#allocation2], %s861_s3  ;;  %s1206_s12 = scalar_lea.sflag (!%p136_p10), [#allocation3], %s157_s30 }
  0x13   : > { %s781_s6 = sshll.u32 (!%p136_p10), %s159_s4, 4  ;;  %s1089_s18 = smov (!%p136_p10), [#allocation2]   ;;  %s1200_s6 = int_to_ptr.vmem [resolvable:$true] %s781_s6 }
  0x14   : > { %s1007_s16 = scalar_lea.vmem (!%p136_p10), %s1200_s6, 512  ;;  %s1011_s20 = sshll.u32 (!%p136_p10), %s1089_s18, 4  ;;  %s1012_s20 = int_to_ptr.vmem [resolvable:$false] %s1011_s20 }
  0x15   : > { %p1008_p12 = scmp.ne.s32.totalorder (!%p136_p10), %s1200_s6, %s1007_s16  ;;  %p1014_p1 = scmp.lt.s32.totalorder (!%p136_p10), %s1200_s6, %s1012_s20 }
  0x16   : > { %s1265_s23 = smov (!%p161_p11, %s862_s23), 31 }
  0x17   : > { %s863_s24 = sshll.u32 %s1265_s23, 3  ;;  %p1009_p13 = pnand %p1008_p12, %p1147_p4 }
  0x18   : > { %s167_s27 = scalar_lea.vmem %s1253_s1, %s863_s24  ;;  %s1013_s23 = scalar_lea.vmem %s1012_s20, 1024 }
  0x19   : > { %v171_v2 = vld [vmem:[%s167_s27] sm:$0xff]  ;;  %v865_v3 = vld [vmem:[%s167_s27 + $0x8] sm:$0xff]  ;;  %v868_v4 = vld [vmem:[%s167_s27 + $0x10] sm:$0xff]  ;;  %p1010_p0 = pneg %p1009_p13  ;;  %p1015_p2 = scmp.lt.s32.totalorder %s1013_s23, %s1007_s16 }
  0x1a   : > { %909 = vmatpush3.msra.mxu0 %v171_v2  ;;  %914 = vmatpush3.msra.mxu1 %v865_v3  ;;  %v871_v5 = vld [vmem:[%s167_s27 + $0x18] sm:$0xff]  ;;  %v874_v6 = vld [vmem:[%s167_s27 + $0x20] sm:$0xff]  ;;  %v877_v7 = vld [vmem:[%s167_s27 + $0x28] sm:$0xff] }
  0x1b   : > { %911 = vmatmul.mubr.msk.f32.vlgmr.msra.gmra.mrb[0].mxu0 %vm172_vm1, %v170_v1  ;;  %916 = vmatmul.mubr.msk.f32.vlgmr.msra.gmra.mrb[0].mxu1 %vm172_vm1, %v170_v1  ;;  %v880_v8 = vld [vmem:[%s167_s27 + $0x30] sm:$0xff]  ;;  %v883_v9 = vld [vmem:[%s167_s27 + $0x38] sm:$0xff]  ;;  %p1016_p3 = por %p1015_p2, %p1014_p1 }
  0x1c   : > { %918 = vmatprep.subr.mxu0 %v1087_v0  ;;  %923 = vmatprep.subr.mxu1 %v1087_v0 }
  0x1d   : > { %919 = vmatpush3.msra.mxu0 %v868_v4  ;;  %924 = vmatpush3.msra.mxu1 %v871_v5  ;;  %p1017_p5 = pnand %p1016_p3, %p1010_p0 }
  0x1e   : > { %920 = vmatprep.mubr.msk.f32.mxu0 %vm1088_vm0, %v1087_v0  ;;  %925 = vmatprep.mubr.msk.f32.mxu1 %vm1088_vm0, %v1087_v0 }
  0x1f   : > { %921 = vmatmul.mubr.msk.f32.vlgmr.msra.gmra.mrb[2].mxu0 %vm172_vm1, %v170_v1  ;;  %926 = vmatmul.mubr.msk.f32.vlgmr.msra.gmra.mrb[2].mxu1 %vm172_vm1, %v170_v1 }
  0x20   : > { %928 = vmatprep.subr.mxu0 %v1087_v0  ;;  %933 = vmatprep.subr.mxu1 %v1087_v0 }
  0x21   : > { %929 = vmatpush3.msra.mxu0 %v874_v6  ;;  %934 = vmatpush3.msra.mxu1 %v877_v7 }
  0x22   : > { %930 = vmatprep.mubr.msk.f32.mxu0 %vm1088_vm0, %v1087_v0  ;;  %935 = vmatprep.mubr.msk.f32.mxu1 %vm1088_vm0, %v1087_v0 }
  0x23   : > { %931 = vmatmul.mubr.msk.f32.vlgmr.msra.gmra.mrb[4].mxu0 %vm172_vm1, %v170_v1  ;;  %936 = vmatmul.mubr.msk.f32.vlgmr.msra.gmra.mrb[4].mxu1 %vm172_vm1, %v170_v1 }
  0x24   : > { %938 = vmatprep.subr.mxu0 %v1087_v0  ;;  %943 = vmatprep.subr.mxu1 %v1087_v0 }
  0x25   : > { %939 = vmatpush3.msra.mxu0 %v880_v8  ;;  %944 = vmatpush3.msra.mxu1 %v883_v9 }
  0x26   : > { %940 = vmatprep.mubr.msk.f32.mxu0 %vm1088_vm0, %v1087_v0  ;;  %945 = vmatprep.mubr.msk.f32.mxu1 %vm1088_vm0, %v1087_v0 }
  0x27   : > { %941 = vmatmul.mubr.msk.f32.vlgmr.msra.gmra.mrb[6].mxu0 %vm172_vm1, %v170_v1  ;;  %946 = vmatmul.mubr.msk.f32.vlgmr.msra.gmra.mrb[6].mxu1 %vm172_vm1, %v170_v1 }
  0xee   : > { %v242_v10 = vpop.f32.mrb[0].mxu0  ;;  %v316_v11 = vpop.f32.mrb[0].mxu1 }
  0xef   : > { %247 = vst.msk [vmem:[%s159_s4] sm:$0xf] %vm246_vm2, %v242_v10  ;;  %867 = vst.msk [vmem:[%s159_s4 + $0x4] sm:$0xf] %vm246_vm2, %v316_v11  ;;  %v912_v12 = vpop.f32.mrb[1].mxu0  ;;  %v917_v13 = vpop.f32.mrb[1].mxu1 }
  0xf2   : > { %v390_v14 = vpop.f32.mrb[2].mxu0  ;;  %v464_v15 = vpop.f32.mrb[2].mxu1 }
  0xf3   : > { %870 = vst.msk [vmem:[%s159_s4 + $0x8] sm:$0xf] %vm246_vm2, %v390_v14  ;;  %873 = vst.msk [vmem:[%s159_s4 + $0xc] sm:$0xf] %vm246_vm2, %v464_v15  ;;  %v922_v16 = vpop.f32.mrb[3].mxu0  ;;  %v927_v17 = vpop.f32.mrb[3].mxu1 }
  0xf6   : > { %v538_v18 = vpop.f32.mrb[4].mxu0  ;;  %v612_v19 = vpop.f32.mrb[4].mxu1 }
  0xf7   : > { %876 = vst.msk [vmem:[%s159_s4 + $0x10] sm:$0xf] %vm246_vm2, %v538_v18  ;;  %879 = vst.msk [vmem:[%s159_s4 + $0x14] sm:$0xf] %vm246_vm2, %v612_v19  ;;  %v932_v20 = vpop.f32.mrb[5].mxu0  ;;  %v937_v21 = vpop.f32.mrb[5].mxu1 }
  0xfa   : > { %v686_v22 = vpop.f32.mrb[6].mxu0  ;;  %v760_v23 = vpop.f32.mrb[6].mxu1 }
  0xfb   : > { %882 = vst.msk [vmem:[%s159_s4 + $0x18] sm:$0xf] %vm246_vm2, %v686_v22  ;;  %885 = vst.msk [vmem:[%s159_s4 + $0x1c] sm:$0xf] %vm246_vm2, %v760_v23  ;;  %v942_v24 = vpop.f32.mrb[7].mxu0  ;;  %v947_v25 = vpop.f32.mrb[7].mxu1 }
  0xfc   : > { %1020 = shalt.err (!%p1017_p5)
}
  0xfd   : > { %s1021_s24 = scalar_lea.hbm %s1198_s15, 512  ;;  %s1025_s27 = scalar_lea.hbm %s1254_s2, 2048 }
  0xfe   : > { %p1022_p6 = scmp.ne.s32.totalorder %s1198_s15, %s1021_s24  ;;  %p1026_p10 = scmp.lt.u32.totalorder %s1198_s15, %s1254_s2 }
  0xff   : > { %p1027_p11 = scmp.lt.u32.totalorder %s1025_s27, %s1021_s24  ;;  %p1029_p13 = scmp.lt.u32.totalorder %s1021_s24, %s1198_s15 }
 0x100   : > { %p1023_p7 = pnand %p1022_p6, %p1147_p4 }
 0x101   : > { %p1028_p12 = por %p1027_p11, %p1026_p10 }
 0x102   : > { %p1024_p9 = pneg %p1023_p7 }
 0x103   : > { %p1030_p0 = por %p1029_p13, %p1028_p12 }
 0x105   : > { %p1031_p1 = pnand %p1030_p0, %p1024_p9 }
 0x107   : > { %1034 = shalt.err (!%p1031_p1)
}
 0x108   : > { %s1090_s30 = smov 64   ;;  %s1091_s3 = smov 4  }
 0x109   : > { %948 = dma.vmem_to_hbm [thread:$0]  (%p1147_p4), %s1200_s6, 512, %s1198_s15, %s1206_s12, %s1090_s30, %s1090_s30, %s1091_s3  }
 0x10a PF: > { %p954_p2 = scmp.ge.s32.totalorder %s1085_s14, 2  ;;  %s796_s4 = sand.u32 1, %s1065_s9  }
 0x10b   : > { %s797_s5 = scalar_lea.sflag [#allocation3], %s796_s4 }
 0x10c   : > { %p951_p3 = pnand %p954_p2, %p1154_p8 }
 0x10e   : > { %1060 = dma.done.wait (!%p951_p3), %s797_s5, 512  }
 0x10f   : > { %1062 = vsyncadd (!%p951_p3), %s797_s5, 4294966784  ;;  %s15_s14 = sadd.s32 1, %s1085_s14   ;;  %s1257_s9 = smov %s1069_s10 }
 0x110   : > { %p12_p5 = scmp.ge.s32.totalorder %s15_s14, 6   ;;  %s1258_s10 = smov %s1073_s11 }
 0x111   : > { %s1259_s11 = smov %s1160_s22  ;;  %s1260_s12 = smov %s1081_s13 }
 0x112   : > { %s1261_s13 = smov %s1263_s17  ;;  %14 = sbr.rel (!%p12_p5) target bundleno = 4 (0x4), region = 77 }
 0x119   :  { %802 = vsyncpa [#allocation3], 1 }
 0x11a   :  { %804 = vsyncpa [#allocation3 + $0x1], 1 }

</bundles_post_ra>
